<compile_context>
chip_gen: v7x
topology: tpu7x:2x2x1
jax: 0.10.0
libtpu: 0.0.40
codegen_flags: <defaults>
</compile_context>

<pallas_src>
import math

import jax
import jax.numpy as jnp
from jax.experimental import pallas as pl
from jax.experimental.pallas import tpu as pltpu


def _round_up(x, m):
    return (x + m - 1) // m * m


# --------------------------------------------------------------------------- #
# Kernels
# --------------------------------------------------------------------------- #
def _proj_kernel(feat_ref, w12_ref, bias_ref, p1_ref, p2_ref):
    """One MXU pass over stacked weights: p = feat @ [W1^T | W2^T]."""
    opad = p1_ref.shape[-1]
    p = jnp.dot(feat_ref[...], w12_ref[...], preferred_element_type=jnp.float32)
    p1_ref[...] = (p[:, :opad] + bias_ref[...]).astype(p1_ref.dtype)   # feat@W1 + (b1+b2), f32
    p2_ref[...] = p[:, opad:].astype(p2_ref.dtype)                     # feat@W2, bf16


def _agg_kernel(adj_ref, p2_ref, p1_ref, invdeg_ref, out_ref):
    """out[i] accumulates A[i, k] @ proj2[k] over source tiles k (accumulate in-place
    in the resident f32 output block); scale by 1/deg and add proj1 on the last k."""
    k = pl.program_id(1)
    tk = adj_ref.shape[1]

    @pl.when(k == 0)
    def _():
        out_ref[...] = jnp.zeros_like(out_ref)

    if p2_ref.shape[0] == tk:
        # proj2 streamed as a (tk, Opad) tile per k step.
        p2 = p2_ref[...]
    else:
        # proj2 VMEM-resident (constant index_map): slice the k-window in VMEM.
        start = pl.multiple_of(k * tk, tk)
        p2 = p2_ref[pl.ds(start, tk), :]

    # int8 adjacency widened to bf16 in-register; bf16 x bf16 MXU, f32 accumulate.
    out_ref[...] += jnp.dot(adj_ref[...].astype(jnp.bfloat16), p2,
                            preferred_element_type=jnp.float32)

    @pl.when(k == pl.num_programs(1) - 1)
    def _():
        out_ref[...] = p1_ref[...] + invdeg_ref[...] * out_ref[...]


def _fused_small_kernel(adj_ref, featd_ref, feata_ref, w12_ref, bias_ref,
                        invdeg_ref, out_ref):
    """Small-graph fast path: projections + aggregation fused, one pass per row tile."""
    opad = out_ref.shape[-1]
    w12 = w12_ref[...]
    p = jnp.dot(featd_ref[...], w12, preferred_element_type=jnp.float32)
    p1 = p[:, :opad] + bias_ref[...]
    p2 = jnp.dot(feata_ref[...], w12[:, opad:], preferred_element_type=jnp.float32)
    agg = jnp.dot(adj_ref[...].astype(jnp.bfloat16), p2.astype(jnp.bfloat16),
                  preferred_element_type=jnp.float32)
    out_ref[...] = (p1 + invdeg_ref[...] * agg).astype(out_ref.dtype)


# --------------------------------------------------------------------------- #
# Wrapper
# --------------------------------------------------------------------------- #
def graphsage_layer(adj, feat, deg, w1, w2, b1, b2, *, tm=None, tk=None,
                    force_tiled=False):
    """GraphSAGE layer forward (eval path, use_pp=False).

    adj:  [N, N] dense binary adjacency, adj[v, u] = 1 iff edge u -> v
    feat: [N, F]
    deg:  [N] or [N, 1] in-degrees (or None -> computed as adj.sum(axis=1))
    w1, w2: [O, F]  (torch nn.Linear weight layout)
    b1, b2: [O]
    returns [N, O] = feat @ W1^T + b1 + ((adj @ feat) / deg) @ W2^T + b2
    """
    N, F = feat.shape
    O = w1.shape[0]
    Opad = _round_up(O, 128)                 # lane-dense output / weight width

    if deg is None:
        deg = jnp.sum(adj, axis=1)
    deg_f32 = jnp.reshape(deg, (N, 1)).astype(jnp.float32)
    # NOTE: zero in-degree nodes clamp to deg=1 (aggregated term -> 0); the
    # PyTorch reference would yield inf/nan there.
    inv_deg = 1.0 / jnp.maximum(deg_f32, 1.0)

    # Stacked, zero-padded weights: cols [0:Opad) = W1^T, cols [Opad:2*Opad) = W2^T.
    w12 = jnp.zeros((F, 2 * Opad), jnp.float32)
    w12 = w12.at[:, :O].set(w1.T.astype(jnp.float32))
    w12 = w12.at[:, Opad:Opad + O].set(w2.T.astype(jnp.float32))
    bias = jnp.zeros((1, Opad), jnp.float32).at[0, :O].set(
        (b1 + b2).astype(jnp.float32))

    small = (not force_tiled) and N <= 1024 and F <= 2048

    # ------------------------------------------------------------------ #
    # Small-graph fast path: single fused kernel, grid over row tiles only.
    # ------------------------------------------------------------------ #
    if small:
        if tm is None:
            tm = 128 if N <= 512 else 256      # keep >=2 row tiles when possible (v7x)
        Np_r = _round_up(N, tm)
        Np_c = _round_up(N, 128)
        Np_f = max(Np_r, Np_c)
        n_row = Np_r // tm

        # int8 adjacency (exact for binary adjacency), cast BEFORE padding so no
        # padded f32 copy is ever materialized.
        adj_i8 = jnp.pad(adj.astype(jnp.int8), ((0, Np_r - N), (0, Np_c - N)))
        feat_p = jnp.pad(feat.astype(jnp.float32), ((0, Np_f - N), (0, 0)))
        invdeg_p = jnp.pad(inv_deg, ((0, Np_r - N), (0, 0)))

        out_p = pl.pallas_call(
            _fused_small_kernel,
            grid=(n_row,),
            in_specs=[
                pl.BlockSpec((tm, Np_c), lambda i: (i, 0)),      # adj stripe (int8)
                pl.BlockSpec((tm, F), lambda i: (i, 0)),         # feat (dst rows)
                pl.BlockSpec((Np_c, F), lambda i: (0, 0)),       # feat (all src rows)
                pl.BlockSpec((F, 2 * Opad), lambda i: (0, 0)),   # stacked weights
                pl.BlockSpec((1, Opad), lambda i: (0, 0)),       # bias
                pl.BlockSpec((tm, 1), lambda i: (i, 0)),         # inv_deg
            ],
            out_specs=pl.BlockSpec((tm, Opad), lambda i: (i, 0)),
            out_shape=jax.ShapeDtypeStruct((Np_r, Opad), jnp.float32),
            compiler_params=pltpu.CompilerParams(
                dimension_semantics=("parallel",)),
        )(adj_i8, feat_p, feat_p, w12, bias, invdeg_p)
        return out_p[:N, :O]

    # ------------------------------------------------------------------ #
    # Large-graph path: projection kernel + tiled aggregation kernel.
    # ------------------------------------------------------------------ #
    if tm is None:
        tm = 512
        while tm > 128 and _round_up(N, tm) // tm < 2:   # >=2 row tiles for v7x's 2 TCs
            tm //= 2
    if tk is None:
        tk = 2048 if N >= 4096 else (1024 if N >= 1024 else 256)

    Np_r = _round_up(N, tm)        # destination rows, padded per-axis (not lcm)
    Np_c = _round_up(N, tk)        # source columns
    tp = 256                       # projection row tile
    Np_p = _round_up(max(Np_r, Np_c), tp)
    n_row, n_k = Np_r // tm, Np_c // tk

    # Cast to streaming dtypes BEFORE padding (no padded f32 copies in HBM).
    adj_i8 = jnp.pad(adj.astype(jnp.int8), ((0, Np_r - N), (0, Np_c - N)))
    feat_p = jnp.pad(feat.astype(jnp.float32), ((0, Np_p - N), (0, 0)))
    invdeg_p = jnp.pad(inv_deg, ((0, Np_r - N), (0, 0)))

    # ---- kernel 1: fused projections -> proj1 (f32, +bias), proj2 (bf16) ----
    proj1, proj2 = pl.pallas_call(
        _proj_kernel,
        grid=(Np_p // tp,),
        in_specs=[
            pl.BlockSpec((tp, F), lambda i: (i, 0)),
            pl.BlockSpec((F, 2 * Opad), lambda i: (0, 0)),
            pl.BlockSpec((1, Opad), lambda i: (0, 0)),
        ],
        out_specs=(
            pl.BlockSpec((tp, Opad), lambda i: (i, 0)),
            pl.BlockSpec((tp, Opad), lambda i: (i, 0)),
        ),
        out_shape=(
            jax.ShapeDtypeStruct((Np_p, Opad), jnp.float32),
            jax.ShapeDtypeStruct((Np_p, Opad), jnp.bfloat16),
        ),
        compiler_params=pltpu.CompilerParams(
            dimension_semantics=("parallel",)),
    )(feat_p, w12, bias)

    # proj2 VMEM-resident if small enough, else streamed per k tile.
    resident = Np_c * Opad * 2 <= 4 * 1024 * 1024
    if resident:
        p2_spec = pl.BlockSpec((Np_c, Opad), lambda i, k: (0, 0))
        p2_bytes = Np_c * Opad * 2
    else:
        p2_spec = pl.BlockSpec((tk, Opad), lambda i, k: (k, 0))
        p2_bytes = n_row * Np_c * Opad * 2

    # ---- kernel 2: tiled aggregation, accumulate into resident output block ----
    out_p = pl.pallas_call(
        _agg_kernel,
        grid=(n_row, n_k),
        in_specs=[
            pl.BlockSpec((tm, tk), lambda i, k: (i, k)),     # adj tile (int8)
            p2_spec,                                         # proj2 (bf16)
            pl.BlockSpec((tm, Opad), lambda i, k: (i, 0)),   # proj1 (dst rows, f32)
            pl.BlockSpec((tm, 1), lambda i, k: (i, 0)),      # inv_deg (dst rows)
        ],
        out_specs=pl.BlockSpec((tm, Opad), lambda i, k: (i, 0)),
        out_shape=jax.ShapeDtypeStruct((Np_r, Opad), jnp.float32),
        compiler_params=pltpu.CompilerParams(
            dimension_semantics=("parallel", "arbitrary"),
            vmem_limit_bytes=48 * 1024 * 1024,    # conservative vs v7x's 64 MiB/TC
        ),
        cost_estimate=pl.CostEstimate(
            flops=2 * Np_r * Np_c * Opad,
            transcendentals=0,
            bytes_accessed=(Np_r * Np_c            # int8 adjacency (dominant stream)
                            + p2_bytes             # proj2 (once if resident)
                            + Np_r * Opad * 4      # proj1
                            + Np_r * Opad * 4      # output
                            + Np_r * 4),           # inv_deg
        ),
    )(adj_i8, proj2, proj1, invdeg_p)

    return out_p[:N, :O]


# --------------------------------------------------------------------------- #
# Test
# --------------------------------------------------------------------------- #
if __name__ == "__main__":
    key = jax.random.PRNGKey(0)
    N, in_feats, out_feats = 256, 64, 32

    k_adj, k_feat, k_w1, k_w2, k_b1, k_b2 = jax.random.split(key, 6)

    # Random sparse-ish graph as dense adjacency + self-loops (so in_deg >= 1).
    # Degrees are computed from the exact f32 adjacency; the int8 cast inside the
    # wrapper only affects streaming of the 0/1 values, which are exact.
    adj = (jax.random.uniform(k_adj, (N, N)) < 0.1).astype(jnp.float32)
    adj = jnp.maximum(adj, jnp.eye(N, dtype=jnp.float32))
    deg = jnp.sum(adj, axis=1, keepdims=True)  # in-degrees, [N, 1]

    feat = jax.random.normal(k_feat, (N, in_feats), dtype=jnp.float32)

    # Params mirroring reset_parameters(): U(-stdv, stdv), stdv = 1/sqrt(in_feats);
    # nn.Linear weight shape is (out, in).
    stdv = 1.0 / math.sqrt(in_feats)
    w1 = jax.random.uniform(k_w1, (out_feats, in_feats), minval=-stdv, maxval=stdv)
    w2 = jax.random.uniform(k_w2, (out_feats, in_feats), minval=-stdv, maxval=stdv)
    b1 = jax.random.uniform(k_b1, (out_feats,), minval=-stdv, maxval=stdv)
    b2 = jax.random.uniform(k_b2, (out_feats,), minval=-stdv, maxval=stdv)

    # Pure-JAX reference for correctness (original association order).
    ah_ref = (adj @ feat) / deg
    ref = feat @ w1.T + b1 + ah_ref @ w2.T + b2

    # Path 1: small-graph fused fast path (default at this size).
    out_small = jax.block_until_ready(
        graphsage_layer(adj, feat, deg, w1, w2, b1, b2))

    # Path 2: tiled large-graph path (forced, small tiles so the k-reduction and
    # the resident-proj2 slicing are exercised at this N).
    out_tiled = jax.block_until_ready(
        graphsage_layer(adj, feat, deg, w1, w2, b1, b2,
                        force_tiled=True, tm=128, tk=128))

    for out in (out_small, out_tiled):
        assert out.shape == (N, out_feats)
        max_err = float(jnp.max(jnp.abs(out - ref)))
        # bf16 proj2 in the aggregation matmul contributes ~2^-9 relative rounding.
        assert jnp.allclose(out, ref, atol=2e-3, rtol=2e-3), max_err

    print("KERNEL_OK")
</pallas_src>

<mosaic_0001>
module attributes {stable_mosaic.version = 11 : i64} {
  func.func @_fused_small_kernel(%arg0: i32, %arg1: memref<128x256xi8, #tpu.memory_space<vmem>>, %arg2: memref<128x64xf32, #tpu.memory_space<vmem>>, %arg3: memref<256x64xf32, #tpu.memory_space<vmem>>, %arg4: memref<64x256xf32, #tpu.memory_space<vmem>>, %arg5: memref<1x128xf32, #tpu.memory_space<vmem>>, %arg6: memref<128x1xf32, #tpu.memory_space<vmem>>, %arg7: memref<128x128xf32, #tpu.memory_space<vmem>>) attributes {dimension_semantics = [#tpu.dimension_semantics<parallel>], iteration_bounds = array<i64: 2>, scalar_prefetch = 0 : i64, scratch_operands = 0 : i64, tpu.core_type = #tpu.core_type<tc>, window_params = [{transform_indices = @transform_0, window_bounds = array<i64: 128, 256>}, {transform_indices = @transform_1, window_bounds = array<i64: 128, 64>}, {pipeline_mode = #tpu.pipeline_mode<synchronous>, transform_indices = @transform_2, window_bounds = array<i64: 256, 64>}, {pipeline_mode = #tpu.pipeline_mode<synchronous>, transform_indices = @transform_3, window_bounds = array<i64: 64, 256>}, {pipeline_mode = #tpu.pipeline_mode<synchronous>, transform_indices = @transform_4, window_bounds = array<i64: 1, 128>}, {transform_indices = @transform_5, window_bounds = array<i64: 128, 1>}, {transform_indices = @transform_6, window_bounds = array<i64: 128, 128>}]} {
    %c0 = arith.constant 0 : index
    %c0_0 = arith.constant 0 : index
    %0 = vector.load %arg4[%c0, %c0_0] : memref<64x256xf32, #tpu.memory_space<vmem>>, vector<64x256xf32>
    %c0_1 = arith.constant 0 : index
    %c0_2 = arith.constant 0 : index
    %1 = vector.load %arg2[%c0_1, %c0_2] : memref<128x64xf32, #tpu.memory_space<vmem>>, vector<128x64xf32>
    %cst = arith.constant dense<0.000000e+00> : vector<128x256xf32>
    %2 = tpu.matmul %1, %0, %cst {dimension_numbers = #tpu.dot_dimension_numbers<[1], [0], [0], [1], [0, 0, 1, 1], [], []>} : vector<128x64xf32>, vector<64x256xf32>, vector<128x256xf32> -> vector<128x256xf32>
    %3 = vector.extract_strided_slice %2 {offsets = [0, 0], sizes = [128, 128], strides = [1, 1]} : vector<128x256xf32> to vector<128x128xf32>
    %c0_3 = arith.constant 0 : index
    %c0_4 = arith.constant 0 : index
    %4 = vector.load %arg5[%c0_3, %c0_4] : memref<1x128xf32, #tpu.memory_space<vmem>>, vector<1x128xf32>
    %5 = vector.broadcast %4 : vector<1x128xf32> to vector<128x128xf32>
    %6 = arith.addf %3, %5 : vector<128x128xf32>
    %c0_5 = arith.constant 0 : index
    %c0_6 = arith.constant 0 : index
    %7 = vector.load %arg3[%c0_5, %c0_6] : memref<256x64xf32, #tpu.memory_space<vmem>>, vector<256x64xf32>
    %8 = vector.extract_strided_slice %0 {offsets = [0, 128], sizes = [64, 128], strides = [1, 1]} : vector<64x256xf32> to vector<64x128xf32>
    %cst_7 = arith.constant dense<0.000000e+00> : vector<256x128xf32>
    %9 = tpu.matmul %7, %8, %cst_7 {dimension_numbers = #tpu.dot_dimension_numbers<[1], [0], [0], [1], [0, 0, 1, 1], [], []>} : vector<256x64xf32>, vector<64x128xf32>, vector<256x128xf32> -> vector<256x128xf32>
    %c0_8 = arith.constant 0 : index
    %c0_9 = arith.constant 0 : index
    %10 = vector.load %arg1[%c0_8, %c0_9] : memref<128x256xi8, #tpu.memory_space<vmem>>, vector<128x256xi8>
    %11 = arith.sitofp %10 : vector<128x256xi8> to vector<128x256xbf16>
    %12 = arith.truncf %9 : vector<256x128xf32> to vector<256x128xbf16>
    %cst_10 = arith.constant dense<0.000000e+00> : vector<128x128xf32>
    %13 = tpu.matmul %11, %12, %cst_10 {dimension_numbers = #tpu.dot_dimension_numbers<[1], [0], [0], [1], [0, 0, 1, 1], [], []>} : vector<128x256xbf16>, vector<256x128xbf16>, vector<128x128xf32> -> vector<128x128xf32>
    %c0_11 = arith.constant 0 : index
    %c0_12 = arith.constant 0 : index
    %14 = vector.load %arg6[%c0_11, %c0_12] : memref<128x1xf32, #tpu.memory_space<vmem>>, vector<128x1xf32>
    %15 = vector.broadcast %14 : vector<128x1xf32> to vector<128x128xf32>
    %16 = arith.mulf %15, %13 : vector<128x128xf32>
    %17 = arith.addf %6, %16 : vector<128x128xf32>
    %c0_13 = arith.constant 0 : index
    %c0_14 = arith.constant 0 : index
    %18 = vector.load %arg7[%c0_13, %c0_14] : memref<128x128xf32, #tpu.memory_space<vmem>>, vector<128x128xf32>
    tpu.vector_store %arg7[%c0_13, %c0_14], %17 {strides = array<i32>} : memref<128x128xf32, #tpu.memory_space<vmem>>, vector<128x128xf32>,
    return
  }
  func.func @transform_0(%arg0: i32) -> (i32, i32) {
    %c0_i32 = arith.constant 0 : i32
    %c0_i32_0 = arith.constant 0 : i32
    return %arg0, %c0_i32 : i32, i32
  }
  func.func @transform_1(%arg0: i32) -> (i32, i32) {
    %c0_i32 = arith.constant 0 : i32
    %c0_i32_0 = arith.constant 0 : i32
    return %arg0, %c0_i32 : i32, i32
  }
  func.func @transform_2(%arg0: i32) -> (i32, i32) {
    %c0_i32 = arith.constant 0 : i32
    %c0_i32_0 = arith.constant 0 : i32
    %c0_i32_1 = arith.constant 0 : i32
    return %c0_i32, %c0_i32_0 : i32, i32
  }
  func.func @transform_3(%arg0: i32) -> (i32, i32) {
    %c0_i32 = arith.constant 0 : i32
    %c0_i32_0 = arith.constant 0 : i32
    %c0_i32_1 = arith.constant 0 : i32
    return %c0_i32, %c0_i32_0 : i32, i32
  }
  func.func @transform_4(%arg0: i32) -> (i32, i32) {
    %c0_i32 = arith.constant 0 : i32
    %c0_i32_0 = arith.constant 0 : i32
    %c0_i32_1 = arith.constant 0 : i32
    return %c0_i32, %c0_i32_0 : i32, i32
  }
  func.func @transform_5(%arg0: i32) -> (i32, i32) {
    %c0_i32 = arith.constant 0 : i32
    %c0_i32_0 = arith.constant 0 : i32
    return %arg0, %c0_i32 : i32, i32
  }
  func.func @transform_6(%arg0: i32) -> (i32, i32) {
    %c0_i32 = arith.constant 0 : i32
    %c0_i32_0 = arith.constant 0 : i32
    return %arg0, %c0_i32 : i32, i32
  }
}

</mosaic_0001>

<bundles_post_ra>
// kernel: tpu_custom_call.1
= control target key start
LH: loop header
LB: loop body
LE: loop exit
PB: predicated region body
PF: predicated region fallthrough
CT: control target
= control target key end

     0   :  { %11 = vsyncpa [#allocation3], 0  ;;  %s2160_s0 = inlined_call_operand.vmem [shape: s8[256,256], index: 0, kind: input, shape index: {}]   ;;  %s2161_s1 = inlined_call_operand.vmem [shape: f32[256,64], index: 1, kind: input, shape index: {}]   ;;  %s2162_s2 = inlined_call_operand.vmem [shape: f32[256,64], index: 2, kind: input, shape index: {}]   ;;  %s2163_s3 = inlined_call_operand.vmem [shape: f32[64,256], index: 3, kind: input, shape index: {}]   ;;  %s2164_s4 = inlined_call_operand.vmem [shape: f32[1,128], index: 4, kind: input, shape index: {}]   ;;  %s2165_s5 = inlined_call_operand.vmem [shape: f32[256,1], index: 5, kind: input, shape index: {}]   ;;  %s2166_s6 = inlined_call_operand.hbm [shape: f32[256,128], index: 6, kind: output, shape index: {}]  }
   0x1   :  { %13 = vsyncpa [#allocation3 + $0x1], 0  ;;  %s1709_s21 = smov 0   ;;  %s1711_s22 = smov 0  }
   0x2   :  { %s1713_s23 = smov 0   ;;  %s1715_s24 = smov 0  }
   0x3 LB: > { %s1730_s25 = sadd.s32 4294967295, %s1667_s24   ;;  %s1284_s26 = sadd.s32 4294967294, %s1667_s24   ;;  %s1667_s24 = sphi %s1715_s24, %s2173_s24   ;;  %s1663_s23 = sphi %s1713_s23, %s2172_s23   ;;  %s1659_s22 = sphi %s1711_s22, %s2171_s22   ;;  %s1655_s21 = sphi %s1709_s21, %s2170_s21  }
   0x4   : > { %s1734_s27 = sadd.s32 1, %s1667_s24   ;;  %s167_s28 = sadd.s32 1, %s1663_s23 }
   0x5   : > { %s164_s29 = ssub.s32 %s1667_s24, %s1734_s27  ;;  %p177_p0 = scmp.ne.s32.totalorder %s1663_s23, %s1659_s22 }
   0x6   : > { %p165_p1 = scmp.eq.s32.totalorder %s164_s29, 0  ;;  %p178_p2 = scmp.eq.s32.totalorder %s1730_s25, 1 }
   0x7   : > { %p183_p3 = scmp.ne.s32.totalorder %s1659_s22, %s1655_s21  ;;  %p184_p4 = scmp.eq.s32.totalorder %s1284_s26, 1 }
   0x8   : > { %s1745_s30 = scalar_select %p165_p1, %s1663_s23, %s167_s28  }
   0x9   : > { %p1747_p5 = por %p178_p2, %p177_p0  ;;  %p1751_p6 = por %p184_p4, %p183_p3 }
   0xa   : > { %p1287_p7 = scmp.ge.s32.totalorder %s1667_s24, 1  ;;  %p239_p8 = scmp.lt.s32.totalorder %s1667_s24, 3 }
   0xc   : > { %p240_p9 = pnand %p1287_p7, %p239_p8 }
   0xd   : > { %v302_v0 = vld [vmem:[%s2163_s3 + $0x8] sm:$0xff] (!%p240_p9)  ;;  %v304_v1 = vld [vmem:[%s2163_s3 + $0x18] sm:$0xff] (!%p240_p9)  ;;  %v301_v2 = vld [vmem:[%s2163_s3] sm:$0xff] (!%p240_p9)  ;;  %s1292_s15 = sshll.u32 (!%p240_p9), %s1730_s25, 4  ;;  %v1669_v7 = vmov (!%p240_p9), 0.0   ;;  %vm333_vm0 = vcmask (!%p240_p9), 523264  }
   0xe   : > { %243 = sbr.rel (%p240_p9) target bundleno = 635 (0x27b), region = 44  ;;  %v1520_v3 = vpack.c.bf16 (!%p240_p9), %v304_v1, %v302_v0  ;;  %v303_v4 = vld [vmem:[%s2163_s3 + $0x10] sm:$0xff] (!%p240_p9)  ;;  %v306_v5 = vld [vmem:[%s2163_s3 + $0x28] sm:$0xff] (!%p240_p9)  ;;  %v308_v6 = vld [vmem:[%s2163_s3 + $0x38] sm:$0xff] (!%p240_p9)  ;;  %486 = vmatprep.mubr.f32.mxu1 (!%p240_p9), %v1669_v7  ;;  %446 = vmatprep.mubr.f32.mxu0 (!%p240_p9), %v1669_v7  ;;  %p1787_p10 = scmp.lt.s32.totalorder (!%p240_p9), %s1292_s15, 31 }
   0xf   : > { %v1522_v8 = vpack.c.bf16 (!%p240_p9), %v303_v4, %v301_v2  ;;  %v1524_v9 = vpack.c.bf16 (!%p240_p9), %v308_v6, %v306_v5  ;;  %v305_v10 = vld [vmem:[%s2163_s3 + $0x20] sm:$0xff] (!%p240_p9)  ;;  %v307_v11 = vld [vmem:[%s2163_s3 + $0x30] sm:$0xff] (!%p240_p9)  ;;  %v310_v12 = vld [vmem:[%s2163_s3 + $0x48] sm:$0xff] (!%p240_p9)  ;;  %s1289_s29 = sshll.u32 (!%p240_p9), %s1730_s25, 2  ;;  %s1351_s26 = sshll.u32 (!%p240_p9), %s1730_s25, 11 }
  0x10   : > { %1552 = vmatprep.subr.bf16.mxu1 (!%p240_p9), %v1520_v3  ;;  %v312_v13 = vld [vmem:[%s2163_s3 + $0x58] sm:$0xff] (!%p240_p9)  ;;  %1521 = vmatprep.subr.bf16.mxu0 (!%p240_p9), %v1520_v3  ;;  %v1526_v14 = vpack.c.bf16 (!%p240_p9), %v307_v11, %v305_v10  ;;  %v309_v16 = vld [vmem:[%s2163_s3 + $0x40] sm:$0xff] (!%p240_p9)  ;;  %v311_v17 = vld [vmem:[%s2163_s3 + $0x50] sm:$0xff] (!%p240_p9)  ;;  %p281_p11 = scmp.lt.s32.totalorder (!%p240_p9), %s1289_s29, 7  ;;  %s2111_s10 = scalar_lea.hbm (!%p240_p9), %s2166_s6, %s1351_s26 }
  0x11   : > { %1556 = vmatpush1.bf16.msra.mxu1 (!%p240_p9), %v1522_v8  ;;  %1523 = vmatpush1.bf16.msra.mxu0 (!%p240_p9), %v1522_v8  ;;  %v1528_v15 = vpack.c.bf16 (!%p240_p9), %v312_v13, %v310_v12  ;;  %v314_v18 = vld [vmem:[%s2163_s3 + $0x68] sm:$0xff] (!%p240_p9)  ;;  %v316_v19 = vld [vmem:[%s2163_s3 + $0x78] sm:$0xff] (!%p240_p9)  ;;  %v1530_v20 = vpack.c.bf16 (!%p240_p9), %v311_v17, %v309_v16  ;;  %v313_v22 = vld [vmem:[%s2163_s3 + $0x60] sm:$0xff] (!%p240_p9) }
  0x12   : > { %1553 = vmatprep.subr.bf16.mxu1 (!%p240_p9), %v1524_v9  ;;  %1525 = vmatprep.subr.bf16.mxu0 (!%p240_p9), %v1524_v9  ;;  %v1532_v21 = vpack.c.bf16 (!%p240_p9), %v316_v19, %v314_v18  ;;  %v315_v23 = vld [vmem:[%s2163_s3 + $0x70] sm:$0xff] (!%p240_p9)  ;;  %v550_v33 = vld [vmem:[%s2162_s2] sm:$0xff] (!%p240_p9)  ;;  %v551_v34 = vld [vmem:[%s2162_s2 + $0x8] sm:$0xff] (!%p240_p9) }
  0x13   : > { %v1534_v24 = vpack.c.bf16 (!%p240_p9), %v315_v23, %v313_v22  ;;  %v552_v35 = vld [vmem:[%s2162_s2 + $0x10] sm:$0xff] (!%p240_p9)  ;;  %v553_v36 = vld [vmem:[%s2162_s2 + $0x18] sm:$0xff] (!%p240_p9)  ;;  %v554_v37 = vld [vmem:[%s2162_s2 + $0x20] sm:$0xff] (!%p240_p9) }
  0x14   : > { %v555_v38 = vld [vmem:[%s2162_s2 + $0x28] sm:$0xff] (!%p240_p9)  ;;  %v556_v39 = vld [vmem:[%s2162_s2 + $0x30] sm:$0xff] (!%p240_p9)  ;;  %v557_v40 = vld [vmem:[%s2162_s2 + $0x38] sm:$0xff] (!%p240_p9) }
  0x15   : > { %s2175_s15 = smov (!%p1787_p10, %s1292_s15), 31  ;;  %1557 = vmatpush1.bf16.msra.mxu1 %v1526_v14  ;;  %1527 = vmatpush1.bf16.msra.mxu0 %v1526_v14  ;;  %v558_v41 = vld [vmem:[%s2162_s2 + $0x40] sm:$0xff]  ;;  %v559_v42 = vld [vmem:[%s2162_s2 + $0x48] sm:$0xff]  ;;  %v560_v43 = vld [vmem:[%s2162_s2 + $0x50] sm:$0xff]  ;;  %s2177_s29 = smov (!%p281_p11, %s1289_s29), 7 }
  0x16   : > { %1554 = vmatprep.subr.bf16.mxu1 %v1528_v15  ;;  %1529 = vmatprep.subr.bf16.mxu0 %v1528_v15  ;;  %s1293_s16 = sshll.u32 %s2175_s15, 3  ;;  %v561_v44 = vld [vmem:[%s2162_s2 + $0x58] sm:$0xff]  ;;  %v562_v45 = vld [vmem:[%s2162_s2 + $0x60] sm:$0xff]  ;;  %v563_v46 = vld [vmem:[%s2162_s2 + $0x68] sm:$0xff]  ;;  %s1350_s9 = sshll.u32 %s2177_s29, 4 }
  0x17   : > { %s1822_s18 = scalar_lea.vmem %s2161_s1, %s1293_s16  ;;  %v564_v47 = vld [vmem:[%s2162_s2 + $0x70] sm:$0xff]  ;;  %v565_v48 = vld [vmem:[%s2162_s2 + $0x78] sm:$0xff]  ;;  %v566_v49 = vld [vmem:[%s2162_s2 + $0x80] sm:$0xff]  ;;  %s2002_s12 = scalar_lea.vmem %s2160_s0, %s1350_s9 }
  0x18   : > { %v325_v25 = vld [vmem:[%s1822_s18 + $0x40] sm:$0xff]  ;;  %v326_v26 = vld [vmem:[%s1822_s18 + $0x48] sm:$0xff]  ;;  %v327_v27 = vld [vmem:[%s1822_s18 + $0x50] sm:$0xff]  ;;  %s2029_s13 = scalar_lea.vmem %s2165_s5, %s1293_s16  ;;  %s277_s15 = sand.u32 1, %s1659_s22  }
  0x19   : > { %1558 = vmatpush1.bf16.msra.mxu1 %v1530_v20  ;;  %1531 = vmatpush1.bf16.msra.mxu0 %v1530_v20  ;;  %v328_v28 = vld [vmem:[%s1822_s18 + $0x58] sm:$0xff]  ;;  %v329_v29 = vld [vmem:[%s1822_s18 + $0x60] sm:$0xff]  ;;  %v330_v30 = vld [vmem:[%s1822_s18 + $0x68] sm:$0xff]  ;;  %s1288_s16 = sshll.u32 %s277_s15, 7  ;;  %s2119_s25 = scalar_lea.sflag [#allocation3], %s277_s15 }
  0x1a   : > { %1555 = vmatprep.subr.bf16.mxu1 %v1532_v21  ;;  %1533 = vmatprep.subr.bf16.mxu0 %v1532_v21  ;;  %v331_v31 = vld [vmem:[%s1822_s18 + $0x70] sm:$0xff]  ;;  %v332_v32 = vld [vmem:[%s1822_s18 + $0x78] sm:$0xff]  ;;  %v567_v50 = vld [vmem:[%s2162_s2 + $0x88] sm:$0xff]  ;;  %s2067_s20 = scalar_lea.vmem [#allocation2], %s1288_s16 }
  0x1b   : > { %v568_v51 = vld [vmem:[%s2162_s2 + $0x90] sm:$0xff]  ;;  %v569_v52 = vld [vmem:[%s2162_s2 + $0x98] sm:$0xff]  ;;  %v570_v53 = vld [vmem:[%s2162_s2 + $0xa0] sm:$0xff]  ;;  %s1198_s28 = sshll.u32 %s2067_s20, 4  ;;  %s2113_s28 = int_to_ptr.vmem [resolvable:$true] %s1198_s28 }
  0x1c   : > { %v571_v54 = vld [vmem:[%s2162_s2 + $0xa8] sm:$0xff]  ;;  %v572_v55 = vld [vmem:[%s2162_s2 + $0xb0] sm:$0xff]  ;;  %v573_v56 = vld [vmem:[%s2162_s2 + $0xb8] sm:$0xff]  ;;  %s1605_s11 = scalar_lea.vmem %s2113_s28, 2048 }
  0x1d   : > { %1559 = vmatpush1.bf16.msra.mxu1 %v1534_v24  ;;  %1535 = vmatpush1.bf16.msra.mxu0 %v1534_v24  ;;  %v574_v57 = vld [vmem:[%s2162_s2 + $0xc0] sm:$0xff]  ;;  %v575_v58 = vld [vmem:[%s2162_s2 + $0xc8] sm:$0xff]  ;;  %v576_v59 = vld [vmem:[%s2162_s2 + $0xd0] sm:$0xff]  ;;  %p1606_p12 = scmp.ne.s32.totalorder %s2113_s28, %s1605_s11 }
  0x1e   : > { %1537 = vmatprep.subr.bf16.mxu1 %v1520_v3  ;;  %v577_v60 = vld [vmem:[%s2162_s2 + $0xd8] sm:$0xff]  ;;  %v578_v61 = vld [vmem:[%s2162_s2 + $0xe0] sm:$0xff]  ;;  %v579_v62 = vld [vmem:[%s2162_s2 + $0xe8] sm:$0xff] }
  0x1f   : > { %v580_v63 = vld [vmem:[%s2162_s2 + $0xf0] sm:$0xff]  ;;  %v581_v0 = vld [vmem:[%s2162_s2 + $0xf8] sm:$0xff]  ;;  %v317_v1 = vld [vmem:[%s1822_s18] sm:$0xff]  ;;  %p1607_p13 = pnand %p1606_p12, %p1747_p5 }
  0x20   : > { %1304 = vmatmul.mubr.msk.f32.vlgmr.msra.gmra.mrb[0].mxu1 %vm333_vm0, %v325_v25  ;;  %1296 = vmatmul.mubr.msk.f32.vlgmr.msra.gmra.mrb[0].mxu0 %vm333_vm0, %v317_v1  ;;  %v318_v2 = vld [vmem:[%s1822_s18 + $0x8] sm:$0xff]  ;;  %v320_v4 = vld [vmem:[%s1822_s18 + $0x18] sm:$0xff]  ;;  %v321_v5 = vld [vmem:[%s1822_s18 + $0x20] sm:$0xff] }
  0x21   : > { %1539 = vmatpush3.bf16.msra.mxu1 %v1520_v3  ;;  %491 = vmatprep.mubr.f32.mxu1 %v1669_v7  ;;  %v319_v3 = vld [vmem:[%s1822_s18 + $0x10] sm:$0xff]  ;;  %v322_v6 = vld [vmem:[%s1822_s18 + $0x28] sm:$0xff]  ;;  %p1608_p0 = pneg %p1607_p13 }
  0x22   : > { %1541 = vmatprep.subr.bf16.mxu1 %v1524_v9  ;;  %451 = vmatprep.mubr.f32.mxu0 %v1669_v7  ;;  %v323_v8 = vld [vmem:[%s1822_s18 + $0x30] sm:$0xff]  ;;  %v2005_v10 = vld [vmem:[%s2002_s12 + $0x8] sm:$0xff] }
  0x23   : > { %v912_v11 = vunpack.c.l.s8.bf16 %v2005_v10 }
  0x24   : > { %1305 = vmatmul.mubr.msk.f32.gmra.mrb[2].mxu1 %vm333_vm0, %v326_v26  ;;  %1297 = vmatmul.mubr.msk.f32.gmra.mrb[2].mxu0 %vm333_vm0, %v318_v2 }
  0x25   : > { %496 = vmatprep.mubr.f32.mxu1 %v1669_v7  ;;  %1543 = vmatpush3.bf16.msra.mxu1 %v1524_v9  ;;  %v324_v9 = vld [vmem:[%s1822_s18 + $0x38] sm:$0xff] }
  0x26   : > { %1545 = vmatprep.subr.bf16.mxu1 %v1528_v15  ;;  %456 = vmatprep.mubr.f32.mxu0 %v1669_v7 }
  0x28   : > { %1306 = vmatmul.mubr.msk.f32.gmra.mrb[4].mxu1 %vm333_vm0, %v327_v27  ;;  %1298 = vmatmul.mubr.msk.f32.gmra.mrb[4].mxu0 %vm333_vm0, %v319_v3  ;;  %v1670_v27 = vmov 0  }
  0x29   : > { %501 = vmatprep.mubr.f32.mxu1 %v1669_v7  ;;  %1547 = vmatpush3.bf16.msra.mxu1 %v1528_v15 }
  0x2a   : > { %1549 = vmatprep.subr.bf16.mxu1 %v1532_v21  ;;  %461 = vmatprep.mubr.f32.mxu0 %v1669_v7 }
  0x2b   : > { %1603 = vset.pattern.permute.xlu0 %v1670_v27  ;;  %1604 = vset.pattern.permute.xlu1 %v1670_v27 }
  0x2c   : > { %1307 = vmatmul.mubr.msk.f32.gmra.mrb[6].mxu1 %vm333_vm0, %v328_v28  ;;  %1299 = vmatmul.mubr.msk.f32.gmra.mrb[6].mxu0 %vm333_vm0, %v320_v4  ;;  %v1040_v28 = vld [vmem:[%s2029_s13] sm:$0xff] }
  0x2d   : > { %506 = vmatprep.mubr.f32.mxu1 %v1669_v7  ;;  %1551 = vmatpush3.bf16.msra.mxu1 %v1532_v21 }
  0x2e   : > { %466 = vmatprep.mubr.f32.mxu0 %v1669_v7  ;;  %1058 = vperm.xlu0 %1603, %v1040_v28  }
  0x30   : > { %1308 = vmatmul.mubr.msk.f32.gmra.mrb[8].mxu1 %vm333_vm0, %v329_v29  ;;  %1300 = vmatmul.mubr.msk.f32.gmra.mrb[8].mxu0 %vm333_vm0, %v321_v5  ;;  %v1042_v29 = vld [vmem:[%s2029_s13 + $0x10] sm:$0xff] }
  0x31   : > { %511 = vmatprep.mubr.f32.mxu1 %v1669_v7  ;;  %471 = vmatprep.mubr.f32.mxu0 %v1669_v7 }
  0x32   : > { %1068 = vperm.xlu1 %1604, %v1042_v29  }
  0x34   : > { %1309 = vmatmul.mubr.msk.f32.gmra.mrb[10].mxu1 %vm333_vm0, %v330_v30  ;;  %1301 = vmatmul.mubr.msk.f32.gmra.mrb[10].mxu0 %vm333_vm0, %v322_v6  ;;  %v1041_v30 = vld [vmem:[%s2029_s13 + $0x8] sm:$0xff] }
  0x35   : > { %516 = vmatprep.mubr.f32.mxu1 %v1669_v7  ;;  %476 = vmatprep.mubr.f32.mxu0 %v1669_v7 }
  0x36   : > { %1063 = vperm.xlu0 %1603, %v1041_v30  }
  0x38   : > { %1310 = vmatmul.mubr.msk.f32.gmra.mrb[12].mxu1 %vm333_vm0, %v331_v31  ;;  %1302 = vmatmul.mubr.msk.f32.gmra.mrb[12].mxu0 %vm333_vm0, %v323_v8  ;;  %v1043_v31 = vld [vmem:[%s2029_s13 + $0x18] sm:$0xff] }
  0x39   : > { %521 = vmatprep.mubr.f32.mxu1 %v1669_v7  ;;  %481 = vmatprep.mubr.f32.mxu0 %v1669_v7 }
  0x3a   : > { %1073 = vperm.xlu1 %1604, %v1043_v31  }
  0x3c   : > { %1311 = vmatmul.mubr.msk.f32.gmra.mrb[14].mxu1 %vm333_vm0, %v332_v32  ;;  %1303 = vmatmul.mubr.msk.f32.gmra.mrb[14].mxu0 %vm333_vm0, %v324_v9 }
  0x3d   : > { %1472 = vmatprep.mubr.msk.f32.mxu1 %vm333_vm0, %v550_v33  ;;  %975 = vmatprep.mubr.bf16.mxu0 %v912_v11 }
  0x40   : > { %1473 = vmatmul.mubr.msk.f32.vlgmr.msra.gmra.mrb[16].mxu1 %vm333_vm0, %v551_v34 }
  0x41   : > { %1475 = vmatprep.mubr.msk.f32.mxu1 %vm333_vm0, %v552_v35  ;;  %v1045_v35 = vld [vmem:[%s2029_s13 + $0x28] sm:$0xff] }
  0x42   : > { %1083 = vperm.xlu1 %1604, %v1045_v35  }
  0x44   : > { %1476 = vmatmul.mubr.msk.f32.gmra.mrb[18].mxu1 %vm333_vm0, %v553_v36  ;;  %v1044_v36 = vld [vmem:[%s2029_s13 + $0x20] sm:$0xff] }
  0x45   : > { %1478 = vmatprep.mubr.msk.f32.mxu1 %vm333_vm0, %v554_v37  ;;  %1078 = vperm.xlu0 %1603, %v1044_v36   ;;  %v903_v36 = vld [vmem:[%s2002_s12] sm:$0xff] }
  0x48   : > { %1479 = vmatmul.mubr.msk.f32.gmra.mrb[20].mxu1 %vm333_vm0, %v555_v38 }
  0x49   : > { %1481 = vmatprep.mubr.msk.f32.mxu1 %vm333_vm0, %v556_v39 }
  0x4c   : > { %1482 = vmatmul.mubr.msk.f32.gmra.mrb[22].mxu1 %vm333_vm0, %v557_v40  ;;  %v1047_v40 = vld [vmem:[%s2029_s13 + $0x38] sm:$0xff] }
  0x4d   : > { %1484 = vmatprep.mubr.msk.f32.mxu1 %vm333_vm0, %v558_v41  ;;  %v1046_v41 = vld [vmem:[%s2029_s13 + $0x30] sm:$0xff]  ;;  %1093 = vperm.xlu1 %1604, %v1047_v40   ;;  %v906_v40 = vld [vmem:[%s2002_s12 + $0x18] sm:$0xff] }
  0x4e   : > { %1088 = vperm.xlu0 %1603, %v1046_v41   ;;  %v913_v41 = vunpack.c.h.s8.bf16 %v903_v36 }
  0x50   : > { %1485 = vmatmul.mubr.msk.f32.gmra.mrb[24].mxu1 %vm333_vm0, %v559_v42 }
  0x51   : > { %1487 = vmatprep.mubr.msk.f32.mxu1 %vm333_vm0, %v560_v43 }
  0x54   : > { %1488 = vmatmul.mubr.msk.f32.gmra.mrb[26].mxu1 %vm333_vm0, %v561_v44 }
  0x55   : > { %1490 = vmatprep.mubr.msk.f32.mxu1 %vm333_vm0, %v562_v45  ;;  %v1049_v45 = vld [vmem:[%s2029_s13 + $0x48] sm:$0xff] }
  0x56   : > { %1103 = vperm.xlu1 %1604, %v1049_v45   ;;  %v918_v45 = vunpack.c.h.s8.bf16 %v906_v40 }
  0x58   : > { %1491 = vmatmul.mubr.msk.f32.gmra.mrb[28].mxu1 %vm333_vm0, %v563_v46  ;;  %v1048_v46 = vld [vmem:[%s2029_s13 + $0x40] sm:$0xff] }
  0x59   : > { %1493 = vmatprep.mubr.msk.f32.mxu1 %vm333_vm0, %v564_v47  ;;  %1098 = vperm.xlu0 %1603, %v1048_v46   ;;  %v908_v46 = vld [vmem:[%s2002_s12 + $0x28] sm:$0xff] }
  0x5c   : > { %1494 = vmatmul.mubr.msk.f32.gmra.mrb[30].mxu1 %vm333_vm0, %v565_v48 }
  0x5d   : > { %1496 = vmatprep.mubr.msk.f32.mxu1 %vm333_vm0, %v566_v49 }
  0x60   : > { %1497 = vmatmul.mubr.msk.f32.gmra.mrb[32].mxu1 %vm333_vm0, %v567_v50  ;;  %v1051_v50 = vld [vmem:[%s2029_s13 + $0x58] sm:$0xff] }
  0x61   : > { %1499 = vmatprep.mubr.msk.f32.mxu1 %vm333_vm0, %v568_v51  ;;  %v1050_v51 = vld [vmem:[%s2029_s13 + $0x50] sm:$0xff]  ;;  %1113 = vperm.xlu1 %1604, %v1051_v50   ;;  %v922_v50 = vunpack.c.h.s8.bf16 %v908_v46 }
  0x62   : > { %1108 = vperm.xlu0 %1603, %v1050_v51   ;;  %v910_v51 = vld [vmem:[%s2002_s12 + $0x38] sm:$0xff] }
  0x64   : > { %1500 = vmatmul.mubr.msk.f32.gmra.mrb[34].mxu1 %vm333_vm0, %v569_v52 }
  0x65   : > { %1502 = vmatprep.mubr.msk.f32.mxu1 %vm333_vm0, %v570_v53 }
  0x68   : > { %1503 = vmatmul.mubr.msk.f32.gmra.mrb[36].mxu1 %vm333_vm0, %v571_v54 }
  0x69   : > { %1505 = vmatprep.mubr.msk.f32.mxu1 %vm333_vm0, %v572_v55  ;;  %v1053_v55 = vld [vmem:[%s2029_s13 + $0x68] sm:$0xff] }
  0x6a   : > { %1123 = vperm.xlu1 %1604, %v1053_v55  }
  0x6c   : > { %1506 = vmatmul.mubr.msk.f32.gmra.mrb[38].mxu1 %vm333_vm0, %v573_v56  ;;  %v1052_v56 = vld [vmem:[%s2029_s13 + $0x60] sm:$0xff] }
  0x6d   : > { %1508 = vmatprep.mubr.msk.f32.mxu1 %vm333_vm0, %v574_v57  ;;  %1118 = vperm.xlu0 %1603, %v1052_v56   ;;  %v926_v56 = vunpack.c.h.s8.bf16 %v910_v51 }
  0x70   : > { %1509 = vmatmul.mubr.msk.f32.gmra.mrb[40].mxu1 %vm333_vm0, %v575_v58 }
  0x71   : > { %1511 = vmatprep.mubr.msk.f32.mxu1 %vm333_vm0, %v576_v59 }
  0x74   : > { %1512 = vmatmul.mubr.msk.f32.gmra.mrb[42].mxu1 %vm333_vm0, %v577_v60  ;;  %v1055_v60 = vld [vmem:[%s2029_s13 + $0x78] sm:$0xff] }
  0x75   : > { %1514 = vmatprep.mubr.msk.f32.mxu1 %vm333_vm0, %v578_v61  ;;  %v1054_v61 = vld [vmem:[%s2029_s13 + $0x70] sm:$0xff]  ;;  %1133 = vperm.xlu1 %1604, %v1055_v60  }
  0x76   : > { %1128 = vperm.xlu0 %1603, %v1054_v61  }
  0x78   : > { %1515 = vmatmul.mubr.msk.f32.gmra.mrb[44].mxu1 %vm333_vm0, %v579_v62 }
  0x79   : > { %1517 = vmatprep.mubr.msk.f32.mxu1 %vm333_vm0, %v580_v63 }
  0x7c   : > { %1518 = vmatmul.mubr.msk.f32.gmra.mrb[46].mxu1 %vm333_vm0, %v581_v0 }
  0xf3   : > { %v2008_v12 = vpop.f32.mrb[0].mxu1 }
  0xf4   : > { %v490_v7 = vpop.f32.mrb[1].mxu1 }
  0xf7   : > { %v2010_v13 = vpop.f32.mrb[2].mxu1 }
  0xf8   : > { %v495_v14 = vpop.f32.mrb[3].mxu1 }
  0xfb   : > { %v2012_v15 = vpop.f32.mrb[4].mxu1 }
  0xfc   : > { %v500_v16 = vpop.f32.mrb[5].mxu1 }
  0xff   : > { %v2014_v17 = vpop.f32.mrb[6].mxu1 }
 0x100   : > { %v505_v18 = vpop.f32.mrb[7].mxu1 }
 0x103   : > { %v2016_v19 = vpop.f32.mrb[8].mxu1 }
 0x104   : > { %v510_v20 = vpop.f32.mrb[9].mxu1 }
 0x107   : > { %v2018_v21 = vpop.f32.mrb[10].mxu1 }
 0x108   : > { %v515_v22 = vpop.f32.mrb[11].mxu1 }
 0x10b   : > { %v2020_v23 = vpop.f32.mrb[12].mxu1 }
 0x10c   : > { %v520_v24 = vpop.f32.mrb[13].mxu1 }
 0x10f   : > { %v2022_v25 = vpop.f32.mrb[14].mxu1 }
 0x110   : > { %v525_v26 = vpop.f32.mrb[15].mxu1 }
 0x113   : > { %v1474_v32 = vpop.f32.mrb[16].mxu1 }
 0x114   : > { %v744_v33 = vpop.f32.mrb[17].mxu1 }
 0x115   : > { %v927_v34 = vpack.c.bf16 %v1474_v32, %v744_v33 }
 0x117   : > { %v1477_v37 = vpop.f32.mrb[18].mxu1 }
 0x118   : > { %v754_v38 = vpop.f32.mrb[19].mxu1 }
 0x119   : > { %v928_v39 = vpack.c.bf16 %v1477_v37, %v754_v38  ;;  %v911_v38 = vunpack.c.l.s8.bf16 %v903_v36 }
 0x11b   : > { %v1480_v42 = vpop.f32.mrb[20].mxu1 }
 0x11c   : > { %v764_v43 = vpop.f32.mrb[21].mxu1 }
 0x11d   : > { %v929_v44 = vpack.c.bf16 %v1480_v42, %v764_v43  ;;  %v916_v42 = vunpack.c.l.s8.bf16 %v906_v40  ;;  %v905_v43 = vld [vmem:[%s2002_s12 + $0x10] sm:$0xff] }
 0x11f   : > { %v1483_v47 = vpop.f32.mrb[22].mxu1 }
 0x120   : > { %v774_v48 = vpop.f32.mrb[23].mxu1 }
 0x121   : > { %v930_v49 = vpack.c.bf16 %v1483_v47, %v774_v48  ;;  %v917_v47 = vunpack.c.h.s8.bf16 %v905_v43  ;;  %v920_v48 = vunpack.c.l.s8.bf16 %v908_v46 }
 0x123   : > { %v1486_v52 = vpop.f32.mrb[24].mxu1 }
 0x124   : > { %v784_v53 = vpop.f32.mrb[25].mxu1 }
 0x125   : > { %v931_v54 = vpack.c.bf16 %v1486_v52, %v784_v53  ;;  %v924_v53 = vunpack.c.l.s8.bf16 %v910_v51 }
 0x127   : > { %v1489_v57 = vpop.f32.mrb[26].mxu1 }
 0x128   : > { %v794_v58 = vpop.f32.mrb[27].mxu1 }
 0x129   : > { %v932_v59 = vpack.c.bf16 %v1489_v57, %v794_v58  ;;  %v448_v57 = vpop.f32.mrb[0].mxu0 }
 0x12a   : > { %v450_v58 = vpop.f32.mrb[1].mxu0 }
 0x12b   : > { %v1492_v62 = vpop.f32.mrb[28].mxu1  ;;  %v453_v60 = vpop.f32.mrb[2].mxu0 }
 0x12c   : > { %v804_v63 = vpop.f32.mrb[29].mxu1  ;;  %v455_v61 = vpop.f32.mrb[3].mxu0 }
 0x12d   : > { %v933_v0 = vpack.c.bf16 %v1492_v62, %v804_v63  ;;  %v458_v62 = vpop.f32.mrb[4].mxu0 }
 0x12e   : > { %v460_v63 = vpop.f32.mrb[5].mxu0 }
 0x12f   : > { %v1495_v1 = vpop.f32.mrb[30].mxu1 }
 0x130   : > { %v814_v2 = vpop.f32.mrb[31].mxu1 }
 0x131   : > { %v934_v3 = vpack.c.bf16 %v1495_v1, %v814_v2 }
 0x133   : > { %v1498_v4 = vpop.f32.mrb[32].mxu1 }
 0x134   : > { %v824_v5 = vpop.f32.mrb[33].mxu1 }
 0x135   : > { %v935_v6 = vpack.c.bf16 %v1498_v4, %v824_v5 }
 0x137   : > { %v1501_v8 = vpop.f32.mrb[34].mxu1  ;;  %1392 = vmatprep.subr.bf16.mxu0 %v935_v6 }
 0x138   : > { %v834_v9 = vpop.f32.mrb[35].mxu1  ;;  %1393 = vmatpush3.bf16.msra.mxu0 %v927_v34 }
 0x139   : > { %v936_v11 = vpack.c.bf16 %v1501_v8, %v834_v9 }
 0x13b   : > { %v1504_v7 = vpop.f32.mrb[36].mxu1  ;;  %1394 = vmatprep.subr.bf16.mxu0 %v936_v11 }
 0x13c   : > { %v844_v14 = vpop.f32.mrb[37].mxu1  ;;  %1395 = vmatpush3.bf16.msra.mxu0 %v928_v39  ;;  %v914_v39 = vunpack.c.h.s8.bf16 %v2005_v10  ;;  %v907_v10 = vld [vmem:[%s2002_s12 + $0x20] sm:$0xff] }
 0x13d   : > { %v937_v16 = vpack.c.bf16 %v1504_v7, %v844_v14  ;;  %v921_v52 = vunpack.c.h.s8.bf16 %v907_v10  ;;  %v1059_v7 = vpop.permute.xlu0 %1058 }
 0x13f   : > { %v1507_v18 = vpop.f32.mrb[38].mxu1  ;;  %1396 = vmatprep.subr.bf16.mxu0 %v937_v16 }
 0x140   : > { %v854_v20 = vpop.f32.mrb[39].mxu1  ;;  %1397 = vmatpush3.bf16.msra.mxu0 %v929_v44  ;;  %v915_v44 = vunpack.c.l.s8.bf16 %v905_v43 }
 0x141   : > { %v938_v22 = vpack.c.bf16 %v1507_v18, %v854_v20 }
 0x143   : > { %v1510_v24 = vpop.f32.mrb[40].mxu1  ;;  %1398 = vmatprep.subr.bf16.mxu0 %v938_v22  ;;  %v2063_v22 = vld [vmem:[%s2164_s4] ss:$0 sm:$0xff] }
 0x144   : > { %v864_v26 = vpop.f32.mrb[41].mxu1  ;;  %1399 = vmatpush3.bf16.msra.mxu0 %v930_v49  ;;  %v919_v49 = vunpack.c.l.s8.bf16 %v907_v10  ;;  %v536_v40 = vadd.f32 %v2063_v22, %v458_v62 }
 0x145   : > { %v939_v27 = vpack.c.bf16 %v1510_v24, %v864_v26  ;;  %v1064_v26 = vpop.permute.xlu0 %1063 }
 0x147   : > { %v1513_v28 = vpop.f32.mrb[42].mxu1  ;;  %1400 = vmatprep.subr.bf16.mxu0 %v939_v27  ;;  %v534_v27 = vadd.f32 %v2063_v22, %v448_v57 }
 0x148   : > { %v874_v29 = vpop.f32.mrb[43].mxu1  ;;  %1401 = vmatpush3.bf16.msra.mxu0 %v931_v54  ;;  %v909_v54 = vld [vmem:[%s2002_s12 + $0x30] sm:$0xff]  ;;  %s1671_s12 = smov [#allocation2]  }
 0x149   : > { %v940_v30 = vpack.c.bf16 %v1513_v28, %v874_v29  ;;  %v923_v55 = vunpack.c.l.s8.bf16 %v909_v54  ;;  %v1079_v51 = vpop.permute.xlu0 %1078  ;;  %s1609_s18 = sshll.u32 %s1671_s12, 4  ;;  %s1610_s18 = int_to_ptr.vmem [resolvable:$false] %s1609_s18 }
 0x14a   : > { %s1611_s14 = scalar_lea.vmem %s1610_s18, 4096  ;;  %p1612_p1 = scmp.lt.s32.totalorder %s2113_s28, %s1610_s18 }
 0x14b   : > { %v1516_v31 = vpop.f32.mrb[44].mxu1  ;;  %1402 = vmatprep.subr.bf16.mxu0 %v940_v30  ;;  %v535_v30 = vadd.f32 %v2063_v22, %v453_v60  ;;  %p1613_p2 = scmp.lt.s32.totalorder %s1611_s14, %s1605_s11 }
 0x14c   : > { %v884_v32 = vpop.f32.mrb[45].mxu1  ;;  %1403 = vmatpush3.bf16.msra.mxu0 %v932_v59  ;;  %v925_v59 = vunpack.c.h.s8.bf16 %v909_v54 }
 0x14d   : > { %v941_v33 = vpack.c.bf16 %v1516_v31, %v884_v32  ;;  %p1614_p3 = por %p1613_p2, %p1612_p1 }
 0x14f   : > { %v1519_v34 = vpop.f32.mrb[46].mxu1  ;;  %1404 = vmatprep.subr.bf16.mxu0 %v941_v33  ;;  %v1069_v33 = vpop.permute.xlu1 %1068  ;;  %p1615_p4 = pnand %p1614_p3, %p1608_p0 }
 0x150   : > { %v894_v35 = vpop.f32.mrb[47].mxu1  ;;  %1405 = vmatpush3.bf16.msra.mxu0 %v933_v0  ;;  %v463_v0 = vpop.f32.mrb[6].mxu0 }
 0x151   : > { %v942_v37 = vpack.c.bf16 %v1519_v34, %v894_v35  ;;  %v465_v1 = vpop.f32.mrb[7].mxu0 }
 0x152   : > { %v468_v2 = vpop.f32.mrb[8].mxu0  ;;  %v1089_v1 = vpop.permute.xlu0 %1088 }
 0x153   : > { %1406 = vmatprep.subr.bf16.mxu0 %v942_v37  ;;  %v1074_v43 = vpop.permute.xlu1 %1073 }
 0x154   : > { %1407 = vmatpush3.bf16.msra.mxu0 %v934_v3  ;;  %v470_v3 = vpop.f32.mrb[9].mxu0 }
 0x155   : > { %v473_v4 = vpop.f32.mrb[10].mxu0 }
 0x156   : > { %v475_v5 = vpop.f32.mrb[11].mxu0  ;;  %v539_v57 = vadd.f32 %v2063_v22, %v473_v4 }
 0x157   : > { %976 = vmatmul.mubr.bf16.vlgmr.msra.gmra.mrb[16].mxu0 %v911_v38  ;;  %v478_v6 = vpop.f32.mrb[12].mxu0 }
 0x158   : > { %983 = vmatprep.mubr.bf16.mxu0 %v914_v39  ;;  %v480_v8 = vpop.f32.mrb[13].mxu0 }
 0x159   : > { %v2055_v9 = vpop.f32.mrb[14].mxu0 }
 0x15a   : > { %v485_v11 = vpop.f32.mrb[15].mxu0  ;;  %v541_v4 = vadd.f32 %v2063_v22, %v2055_v9  ;;  %v543_v9 = vadd.f32 %v2063_v22, %v2010_v13  ;;  %v545_v13 = vadd.f32 %v2063_v22, %v2014_v17  ;;  %v547_v17 = vadd.f32 %v2063_v22, %v2018_v21 }
 0x15f   : > { %984 = vmatmul.mubr.bf16.gmra.mrb[20].mxu0 %v913_v41 }
 0x160   : > { %991 = vmatprep.mubr.bf16.mxu0 %v916_v42 }
 0x167   : > { %992 = vmatmul.mubr.bf16.gmra.mrb[24].mxu0 %v915_v44  ;;  %v537_v44 = vadd.f32 %v2063_v22, %v463_v0 }
 0x168   : > { %999 = vmatprep.mubr.bf16.mxu0 %v918_v45 }
 0x16f   : > { %1000 = vmatmul.mubr.bf16.gmra.mrb[28].mxu0 %v917_v47 }
 0x170   : > { %1007 = vmatprep.mubr.bf16.mxu0 %v920_v48 }
 0x177   : > { %1008 = vmatmul.mubr.bf16.gmra.mrb[32].mxu0 %v919_v49 }
 0x178   : > { %1015 = vmatprep.mubr.bf16.mxu0 %v922_v50 }
 0x17f   : > { %1016 = vmatmul.mubr.bf16.gmra.mrb[36].mxu0 %v921_v52 }
 0x180   : > { %1023 = vmatprep.mubr.bf16.mxu0 %v924_v53  ;;  %v538_v53 = vadd.f32 %v2063_v22, %v468_v2  ;;  %v540_v2 = vadd.f32 %v2063_v22, %v478_v6  ;;  %v542_v6 = vadd.f32 %v2063_v22, %v2008_v12  ;;  %v544_v12 = vadd.f32 %v2063_v22, %v2012_v15 }
 0x181   : > { %v546_v15 = vadd.f32 %v2063_v22, %v2016_v19 }
 0x187   : > { %1024 = vmatmul.mubr.bf16.gmra.mrb[40].mxu0 %v923_v55 }
 0x188   : > { %1031 = vmatprep.mubr.bf16.mxu0 %v926_v56  ;;  %v1084_v56 = vpop.permute.xlu1 %1083 }
 0x18c   : > { %v1094_v11 = vpop.permute.xlu1 %1093 }
 0x18f   : > { %1032 = vmatmul.mubr.bf16.gmra.mrb[44].mxu0 %v925_v59 }
 0x22a   : > { %v1408_v14 = vpop.f32.mrb[16].mxu0 }
 0x22b   : > { %v1409_v16 = vpop.f32.mrb[17].mxu0 }
 0x22c   : > { %v1410_v18 = vadd.f32 %v1409_v16, %v1408_v14  ;;  %v1411_v20 = vpop.f32.mrb[18].mxu0 }
 0x22d   : > { %v1412_v24 = vpop.f32.mrb[19].mxu0 }
 0x22e   : > { %v1136_v28 = vmul.f32 %v1410_v18, %v1059_v7  ;;  %v1413_v29 = vadd.f32 %v1412_v24, %v1411_v20 }
 0x230   : > { %v1152_v31 = vadd.f32 %v1136_v28, %v534_v27  ;;  %v1137_v32 = vmul.f32 %v1413_v29, %v1064_v26  ;;  %v1099_v27 = vpop.permute.xlu0 %1098 }
 0x232   : > { %1168 = vst [vmem:[%s2067_s20] sm:$0xff] %v1152_v31  ;;  %v1153_v34 = vadd.f32 %v1137_v32, %v535_v30  ;;  %v1414_v35 = vpop.f32.mrb[20].mxu0  ;;  %v1104_v31 = vpop.permute.xlu1 %1103 }
 0x233   : > { %v1415_v36 = vpop.f32.mrb[21].mxu0 }
 0x234   : > { %1169 = vst [vmem:[%s2067_s20 + $0x8] sm:$0xff] %v1153_v34  ;;  %v1416_v37 = vadd.f32 %v1415_v36, %v1414_v35  ;;  %v1417_v38 = vpop.f32.mrb[22].mxu0 }
 0x235   : > { %v1418_v39 = vpop.f32.mrb[23].mxu0 }
 0x236   : > { %v1138_v41 = vmul.f32 %v1416_v37, %v1069_v33  ;;  %v1419_v42 = vadd.f32 %v1418_v39, %v1417_v38  ;;  %v1109_v39 = vpop.permute.xlu0 %1108 }
 0x238   : > { %v1154_v45 = vadd.f32 %v1138_v41, %v536_v40  ;;  %v1139_v46 = vmul.f32 %v1419_v42, %v1074_v43  ;;  %v1114_v43 = vpop.permute.xlu1 %1113 }
 0x23a   : > { %1170 = vst [vmem:[%s2067_s20 + $0x10] sm:$0xff] %v1154_v45  ;;  %v1155_v47 = vadd.f32 %v1139_v46, %v537_v44  ;;  %v1420_v48 = vpop.f32.mrb[24].mxu0 }
 0x23b   : > { %v1421_v10 = vpop.f32.mrb[25].mxu0 }
 0x23c   : > { %1171 = vst [vmem:[%s2067_s20 + $0x18] sm:$0xff] %v1155_v47  ;;  %v1422_v49 = vadd.f32 %v1421_v10, %v1420_v48  ;;  %v1423_v50 = vpop.f32.mrb[26].mxu0 }
 0x23d   : > { %v1424_v52 = vpop.f32.mrb[27].mxu0 }
 0x23e   : > { %v1140_v54 = vmul.f32 %v1422_v49, %v1079_v51  ;;  %v1425_v55 = vadd.f32 %v1424_v52, %v1423_v50  ;;  %v1119_v50 = vpop.permute.xlu0 %1118 }
 0x240   : > { %v1156_v58 = vadd.f32 %v1140_v54, %v538_v53  ;;  %v1141_v59 = vmul.f32 %v1425_v55, %v1084_v56  ;;  %v1124_v54 = vpop.permute.xlu1 %1123 }
 0x242   : > { %1172 = vst [vmem:[%s2067_s20 + $0x20] sm:$0xff] %v1156_v58  ;;  %v1157_v60 = vadd.f32 %v1141_v59, %v539_v57  ;;  %v1426_v61 = vpop.f32.mrb[28].mxu0  ;;  %v1129_v19 = vpop.permute.xlu0 %1128 }
 0x243   : > { %v1427_v62 = vpop.f32.mrb[29].mxu0 }
 0x244   : > { %1173 = vst [vmem:[%s2067_s20 + $0x28] sm:$0xff] %v1157_v60  ;;  %v1428_v63 = vadd.f32 %v1427_v62, %v1426_v61  ;;  %v1429_v0 = vpop.f32.mrb[30].mxu0 }
 0x245   : > { %v1430_v3 = vpop.f32.mrb[31].mxu0 }
 0x246   : > { %v1142_v5 = vmul.f32 %v1428_v63, %v1089_v1  ;;  %v1431_v8 = vadd.f32 %v1430_v3, %v1429_v0  ;;  %v548_v63 = vadd.f32 %v2063_v22, %v2020_v23  ;;  %v1134_v1 = vpop.permute.xlu1 %1133  ;;  %v549_v3 = vadd.f32 %v2063_v22, %v2022_v25 }
 0x248   : > { %v1158_v7 = vadd.f32 %v1142_v5, %v540_v2  ;;  %v1143_v14 = vmul.f32 %v1431_v8, %v1094_v11 }
 0x24a   : > { %1174 = vst [vmem:[%s2067_s20 + $0x30] sm:$0xff] %v1158_v7  ;;  %v1159_v16 = vadd.f32 %v1143_v14, %v541_v4  ;;  %v1432_v18 = vpop.f32.mrb[32].mxu0 }
 0x24b   : > { %v1433_v20 = vpop.f32.mrb[33].mxu0 }
 0x24c   : > { %1175 = vst [vmem:[%s2067_s20 + $0x38] sm:$0xff] %v1159_v16  ;;  %v1434_v24 = vadd.f32 %v1433_v20, %v1432_v18  ;;  %v1435_v26 = vpop.f32.mrb[34].mxu0 }
 0x24d   : > { %v1436_v28 = vpop.f32.mrb[35].mxu0 }
 0x24e   : > { %v1144_v29 = vmul.f32 %v1434_v24, %v1099_v27  ;;  %v1437_v30 = vadd.f32 %v1436_v28, %v1435_v26 }
 0x250   : > { %v1160_v32 = vadd.f32 %v1144_v29, %v542_v6  ;;  %v1145_v33 = vmul.f32 %v1437_v30, %v1104_v31 }
 0x252   : > { %1176 = vst [vmem:[%s2067_s20 + $0x40] sm:$0xff] %v1160_v32  ;;  %v1161_v34 = vadd.f32 %v1145_v33, %v543_v9  ;;  %v1438_v35 = vpop.f32.mrb[36].mxu0 }
 0x253   : > { %v1439_v36 = vpop.f32.mrb[37].mxu0 }
 0x254   : > { %1177 = vst [vmem:[%s2067_s20 + $0x48] sm:$0xff] %v1161_v34  ;;  %v1440_v37 = vadd.f32 %v1439_v36, %v1438_v35  ;;  %v1441_v38 = vpop.f32.mrb[38].mxu0 }
 0x255   : > { %v1442_v40 = vpop.f32.mrb[39].mxu0 }
 0x256   : > { %v1146_v41 = vmul.f32 %v1440_v37, %v1109_v39  ;;  %v1443_v42 = vadd.f32 %v1442_v40, %v1441_v38 }
 0x258   : > { %v1162_v44 = vadd.f32 %v1146_v41, %v544_v12  ;;  %v1147_v45 = vmul.f32 %v1443_v42, %v1114_v43 }
 0x25a   : > { %1178 = vst [vmem:[%s2067_s20 + $0x50] sm:$0xff] %v1162_v44  ;;  %v1163_v46 = vadd.f32 %v1147_v45, %v545_v13  ;;  %v1444_v47 = vpop.f32.mrb[40].mxu0 }
 0x25b   : > { %v1445_v48 = vpop.f32.mrb[41].mxu0 }
 0x25c   : > { %1179 = vst [vmem:[%s2067_s20 + $0x58] sm:$0xff] %v1163_v46  ;;  %v1446_v10 = vadd.f32 %v1445_v48, %v1444_v47  ;;  %v1447_v49 = vpop.f32.mrb[42].mxu0 }
 0x25d   : > { %v1448_v51 = vpop.f32.mrb[43].mxu0 }
 0x25e   : > { %v1148_v52 = vmul.f32 %v1446_v10, %v1119_v50  ;;  %v1449_v53 = vadd.f32 %v1448_v51, %v1447_v49 }
 0x260   : > { %v1164_v55 = vadd.f32 %v1148_v52, %v546_v15  ;;  %v1149_v56 = vmul.f32 %v1449_v53, %v1124_v54 }
 0x262   : > { %1180 = vst [vmem:[%s2067_s20 + $0x60] sm:$0xff] %v1164_v55  ;;  %v1165_v57 = vadd.f32 %v1149_v56, %v547_v17  ;;  %v1450_v58 = vpop.f32.mrb[44].mxu0 }
 0x263   : > { %v1451_v59 = vpop.f32.mrb[45].mxu0 }
 0x264   : > { %1181 = vst [vmem:[%s2067_s20 + $0x68] sm:$0xff] %v1165_v57  ;;  %v1452_v60 = vadd.f32 %v1451_v59, %v1450_v58  ;;  %v1453_v61 = vpop.f32.mrb[46].mxu0 }
 0x265   : > { %v1454_v62 = vpop.f32.mrb[47].mxu0 }
 0x266   : > { %v1150_v0 = vmul.f32 %v1452_v60, %v1129_v19  ;;  %v1455_v21 = vadd.f32 %v1454_v62, %v1453_v61 }
 0x268   : > { %v1166_v2 = vadd.f32 %v1150_v0, %v548_v63  ;;  %v1151_v5 = vmul.f32 %v1455_v21, %v1134_v1 }
 0x26a   : > { %1182 = vst [vmem:[%s2067_s20 + $0x70] sm:$0xff] %v1166_v2  ;;  %v1167_v23 = vadd.f32 %v1151_v5, %v549_v3 }
 0x26c   : > { %1183 = vst [vmem:[%s2067_s20 + $0x78] sm:$0xff] %v1167_v23 }
 0x26d   : > { %1618 = shalt.err (!%p1615_p4)
}
 0x26e   : > { %s1619_s13 = scalar_lea.hbm %s2111_s10, 2048  ;;  %s1623_s17 = scalar_lea.hbm %s2166_s6, 4096 }
 0x26f   : > { %p1620_p7 = scmp.ne.s32.totalorder %s2111_s10, %s1619_s13  ;;  %p1624_p10 = scmp.lt.u32.totalorder %s2111_s10, %s2166_s6 }
 0x270   : > { %p1625_p11 = scmp.lt.u32.totalorder %s1623_s17, %s1619_s13  ;;  %p1627_p13 = scmp.lt.u32.totalorder %s1619_s13, %s2111_s10 }
 0x271   : > { %p1621_p8 = pnand %p1620_p7, %p1747_p5 }
 0x272   : > { %p1626_p12 = por %p1625_p11, %p1624_p10 }
 0x273   : > { %p1622_p9 = pneg %p1621_p8 }
 0x274   : > { %p1628_p0 = por %p1627_p13, %p1626_p12 }
 0x276   : > { %p1629_p1 = pnand %p1628_p0, %p1622_p9 }
 0x278   : > { %1632 = shalt.err (!%p1629_p1)
}
 0x279   : > { %s1672_s26 = smov 128   ;;  %s1673_s29 = smov 8  }
 0x27a   : > { %1560 = dma.vmem_to_hbm [thread:$0]  (%p1747_p5), %s2113_s28, 2048, %s2111_s10, %s2119_s25, %s1672_s26, %s1672_s26, %s1673_s29  }
 0x27b PF: > { %p1566_p2 = scmp.ge.s32.totalorder %s1667_s24, 2  ;;  %s1213_s9 = sand.u32 1, %s1655_s21  }
 0x27c   : > { %s1214_s11 = scalar_lea.sflag [#allocation3], %s1213_s9 }
 0x27d   : > { %p1563_p3 = pnand %p1566_p2, %p1751_p6 }
 0x27f   : > { %1650 = dma.done.wait (!%p1563_p3), %s1214_s11, 2048  }
 0x280   : > { %1652 = vsyncadd (!%p1563_p3), %s1214_s11, 4294965248  ;;  %p16_p4 = scmp.ge.s32.totalorder %s1734_s27, 4   ;;  %s2170_s21 = smov %s1659_s22 }
 0x281   : > { %s2171_s22 = smov %s1663_s23  ;;  %s2172_s23 = smov %s1745_s30 }
 0x282   : > { %s2173_s24 = smov %s1734_s27  ;;  %18 = sbr.rel (!%p16_p4) target bundleno = 3 (0x3), region = 85 }
 0x289   :  { %1219 = vsyncpa [#allocation3], 1 }
 0x28a   :  { %1221 = vsyncpa [#allocation3 + $0x1], 1 }

</bundles_post_ra>
